<compile_context>
chip_gen: v6e
topology: v6e:2x2x1
jax: 0.10.0
libtpu: 0.0.40
codegen_flags: <defaults>
</compile_context>

<pallas_src>
import functools

import jax
import jax.numpy as jnp
from jax.experimental import pallas as pl
from jax.experimental.pallas import tpu as pltpu

LANES = 128  # TPU lane width; batch is padded to a multiple of this.


def _midam_att_loss_kernel(params_ref, x_ref, out_ref):
    """params_ref (SMEM f32[3]): [a, b, alpha].

    x_ref (VMEM f32[5, R, 128]) planes: sn, sd, vsn, vsd, y — lane-padded;
    padded lanes carry (sn, sd, vsn, vsd, y) = (0, 1, 0, 1, -1) so they drop
    out of both class masks and produce no NaN/Inf.

    out_ref (SMEM f32[1, 1]): the scalar loss.
    """
    a = params_ref[0]
    b = params_ref[1]
    alpha = params_ref[2]

    sn = x_ref[0]
    sd = x_ref[1]
    vsn = x_ref[2]
    vsd = jnp.maximum(x_ref[3], 1e-8)            # clamp used for the loss only

    # EUP approximate reciprocal + one Newton step (≈ exact-divide parity,
    # two extra VPU ops) replaces the three f32 divides of the reference.
    inv_vsd = pl.reciprocal(vsd, approx=True)
    inv_vsd = inv_vsd * (2.0 - vsd * inv_vsd)

    r = vsn * inv_vsd
    snd = jax.nn.sigmoid(r)                      # EUP
    gsnd = snd * (1.0 - snd)
    gw_att = gsnd * inv_vsd * (sn - r * sd)

    y = x_ref[4]
    mask_p = (y == 1.0).astype(jnp.float32)
    mask_n = (y == 0.0).astype(jnp.float32)
    # Per-class reciprocals computed in-kernel from the pad-safe masks.
    # If a class is empty this is inf and the loss is NaN — matching
    # torch.mean over an empty selection.
    inv_p = 1.0 / jnp.sum(mask_p)
    inv_n = 1.0 / jnp.sum(mask_n)

    # loss = mean_p[2(snd-a)gw_att] + mean_n[2(snd-b)gw_att]
    #        + alpha*(mean_n[gw_att] - mean_p[gw_att])
    #        + mean_p[(snd-a)^2] + mean_n[(snd-b)^2]
    # folded into a single per-element weight -> one final reduction.
    dp = snd - a
    dn = snd - b
    wp = dp * dp + (dp + dp - alpha) * gw_att
    wn = dn * dn + (dn + dn + alpha) * gw_att
    w = (mask_p * wp) * inv_p + (mask_n * wn) * inv_n

    out_ref[0, 0] = jnp.sum(w)


@functools.partial(jax.jit, donate_argnums=(0, 1))
def _midam_forward(sn_state, sd_state, a, b, alpha, gamma, sn, sd, y_true, index):
    sn = jnp.reshape(sn, (-1,)).astype(jnp.float32)
    sd = jnp.reshape(sd, (-1,)).astype(jnp.float32)
    y = jnp.reshape(y_true, (-1,)).astype(jnp.float32)
    index = jnp.reshape(index, (-1,))
    B = sn.shape[0]

    # TODO(synk): the state gather / EMA / scatter stays in the surrounding
    # jit: the per-sample dynamic indices cannot be expressed as a rectangular
    # BlockSpec window, and an in-kernel replacement would need ~4*B tiny
    # element DMAs; XLA's fused gather/scatter on this small state is cheaper
    # and keeps the kernel a single custom call with one packed operand.
    vsn = (1.0 - gamma) * sn_state[index, 0] + gamma * sn
    vsd = (1.0 - gamma) * sd_state[index, 0] + gamma * sd
    new_sn_state = sn_state.at[index, 0].set(vsn)
    new_sd_state = sd_state.at[index, 0].set(vsd)   # stored UNclamped (parity)

    params = jnp.concatenate([a, b, alpha]).astype(jnp.float32)  # SMEM f32[3]

    # Pack the five per-sample rows sublane-dense: (5, Bp//128, 128).
    Bp = max(LANES, ((B + LANES - 1) // LANES) * LANES)
    R = Bp // LANES
    rows = jnp.stack([sn, sd, vsn, vsd, y], axis=0)              # (5, B)
    pad_fill = jnp.array([0.0, 1.0, 0.0, 1.0, -1.0],
                         jnp.float32)[:, None]                   # NaN-safe pads
    packed = jnp.concatenate(
        [rows, jnp.broadcast_to(pad_fill, (5, Bp - B))],
        axis=1).reshape(5, R, LANES)

    # TODO(synk): for very large batches (Bp >= ~8-16K lanes) add a lane-block
    # grid with dimension_semantics=("parallel",) and pl.when-finalized
    # partial sums so v7x's 2 TensorCores both contribute; VMEM budget is a
    # non-issue on v5e/v6e/v7x, and at typical MIL batch sizes the single-shot
    # path avoids the ~0.35 us/grid-step overhead.
    loss = pl.pallas_call(
        _midam_att_loss_kernel,
        out_shape=jax.ShapeDtypeStruct((1, 1), jnp.float32),
        in_specs=[
            pl.BlockSpec(memory_space=pltpu.MemorySpace.SMEM),   # [a, b, alpha]
            pl.BlockSpec(memory_space=pltpu.MemorySpace.VMEM),   # packed tiles
        ],
        out_specs=pl.BlockSpec(memory_space=pltpu.MemorySpace.SMEM),
    )(params, packed)

    return loss[0, 0], new_sn_state, new_sd_state


class MIDAMAttentionPoolingLoss:
    """JAX/Pallas port of libauc.losses.MIDAM_attention_pooling_loss (forward)."""

    def __init__(self, data_len, margin=1.0, gamma=0.9):
        self.gamma = float(gamma)
        self.margin = float(margin)   # kept for parity; unused in forward
        self.data_len = int(data_len)
        self.sn = jnp.ones((data_len, 1), jnp.float32)
        self.sd = jnp.ones((data_len, 1), jnp.float32)
        self.a = jnp.zeros((1,), jnp.float32)
        self.b = jnp.zeros((1,), jnp.float32)
        self.alpha = jnp.zeros((1,), jnp.float32)

    def update_smoothing(self, decay_factor):
        self.gamma = self.gamma / float(decay_factor)

    def __call__(self, y_pred, y_true, index):
        sn, sd = y_pred
        # TODO(synk): the in-place nn.Module buffer mutation (self.sn[index]=...)
        # has no in-kernel equivalent; it is done functionally inside the fused
        # jit (with donated buffers) and the new state rebinds the attributes.
        loss, self.sn, self.sd = _midam_forward(
            self.sn, self.sd, self.a, self.b, self.alpha,
            jnp.float32(self.gamma),
            jnp.asarray(sn), jnp.asarray(sd),
            jnp.asarray(y_true), jnp.asarray(index))
        return loss


def _reference_forward(state_sn, state_sd, a, b, alpha, gamma, sn, sd, y_true, index):
    """Pure-JAX mirror of the PyTorch forward (exact divides). Returns
    (loss, new_state_sn, new_state_sd)."""
    gamma = jnp.float32(gamma)
    sn = jnp.reshape(sn, (-1,)).astype(jnp.float32)
    sd = jnp.reshape(sd, (-1,)).astype(jnp.float32)
    y = jnp.reshape(y_true, (-1,)).astype(jnp.float32)
    index = jnp.reshape(index, (-1,))

    vsn = (1.0 - gamma) * state_sn[index, 0] + gamma * sn
    vsd_store = (1.0 - gamma) * state_sd[index, 0] + gamma * sd
    state_sn = state_sn.at[index, 0].set(vsn)
    state_sd = state_sd.at[index, 0].set(vsd_store)

    vsd = jnp.maximum(vsd_store, 1e-8)
    snd = jax.nn.sigmoid(vsn / vsd)
    gsnd = snd * (1.0 - snd)
    gw_att = gsnd * (sn / vsd - vsn / vsd ** 2 * sd)
    mp = y == 1.0
    mn = y == 0.0

    def mmean(v, m):
        return jnp.sum(jnp.where(m, v, 0.0)) / jnp.sum(m)

    gw_p = mmean(2.0 * (snd - a) * gw_att, mp)
    gw_n = mmean(2.0 * (snd - b) * gw_att, mn)
    gw_s = alpha * (mmean(gw_att, mn) - mmean(gw_att, mp))
    ga = mmean((snd - a) ** 2, mp)
    gb = mmean((snd - b) ** 2, mn)
    return gw_p + gw_n + gw_s + ga + gb, state_sn, state_sd


if __name__ == "__main__":
    key = jax.random.PRNGKey(0)
    data_len = 64
    B = 16
    keys = jax.random.split(key, 6)

    sn1 = jax.random.normal(keys[0], (B, 1), dtype=jnp.float32)
    sd1 = jax.random.uniform(keys[1], (B, 1), dtype=jnp.float32) + 0.01
    sn2 = jax.random.normal(keys[2], (B, 1), dtype=jnp.float32)
    sd2 = jax.random.uniform(keys[3], (B, 1), dtype=jnp.float32) + 0.01
    y_true = jnp.array([1, 0] * (B // 2), dtype=jnp.int32).reshape(B, 1)
    idx1 = jax.random.permutation(keys[4], data_len)[:B]
    idx2 = jax.random.permutation(keys[5], data_len)[:B]

    loss_fn = MIDAMAttentionPoolingLoss(data_len=data_len, margin=1.0, gamma=0.9)
    # non-trivial a / b / alpha so every loss term is exercised
    loss_fn.a = jnp.array([0.3], jnp.float32)
    loss_fn.b = jnp.array([0.1], jnp.float32)
    loss_fn.alpha = jnp.array([0.2], jnp.float32)

    # pure-JAX reference with its own functional copy of the state
    ref_sn = jnp.ones((data_len, 1), jnp.float32)
    ref_sd = jnp.ones((data_len, 1), jnp.float32)
    ref1, ref_sn, ref_sd = _reference_forward(ref_sn, ref_sd, 0.3, 0.1, 0.2, 0.9,
                                              sn1, sd1, y_true, idx1)
    ref2, ref_sn, ref_sd = _reference_forward(ref_sn, ref_sd, 0.3, 0.1, 0.2, 0.9,
                                              sn2, sd2, y_true, idx2)

    out1 = loss_fn((sn1, sd1), y_true, idx1)
    out2 = loss_fn((sn2, sd2), y_true, idx2)
    out2 = jax.block_until_ready(out2)

    # Newton-refined reciprocal -> near exact-divide parity; keep a safe margin.
    TOL = 1e-3
    assert bool(jnp.isfinite(out1)) and bool(jnp.isfinite(out2)), "loss not finite"
    assert jnp.allclose(out1, ref1, atol=TOL, rtol=TOL), (out1, ref1)
    assert jnp.allclose(out2, ref2, atol=TOL, rtol=TOL), (out2, ref2)
    assert jnp.allclose(loss_fn.sn, ref_sn, atol=1e-6, rtol=1e-6), "sn state mismatch"
    assert jnp.allclose(loss_fn.sd, ref_sd, atol=1e-6, rtol=1e-6), "sd state mismatch"
    print("KERNEL_OK")
</pallas_src>

<mosaic_0001>
module attributes {stable_mosaic.version = 11 : i64} {
  func.func @_midam_att_loss_kernel(%arg0: memref<3xf32, #tpu.memory_space<smem>>, %arg1: memref<5x1x128xf32, #tpu.memory_space<vmem>>, %arg2: memref<1x1xf32, #tpu.memory_space<smem>>) attributes {dimension_semantics = [], scalar_prefetch = 0 : i64, scratch_operands = 0 : i64, tpu.core_type = #tpu.core_type<tc>} {
    %c0 = arith.constant 0 : index
    %0 = memref.load %arg0[%c0] : memref<3xf32, #tpu.memory_space<smem>>
    %c1 = arith.constant 1 : index
    %1 = memref.load %arg0[%c1] : memref<3xf32, #tpu.memory_space<smem>>
    %c2 = arith.constant 2 : index
    %2 = memref.load %arg0[%c2] : memref<3xf32, #tpu.memory_space<smem>>
    %c0_0 = arith.constant 0 : index
    %c0_1 = arith.constant 0 : index
    %c0_2 = arith.constant 0 : index
    %3 = vector.load %arg1[%c0_0, %c0_1, %c0_2] : memref<5x1x128xf32, #tpu.memory_space<vmem>>, vector<1x1x128xf32>
    %4 = vector.shape_cast %3 : vector<1x1x128xf32> to vector<1x128xf32>
    %c1_3 = arith.constant 1 : index
    %c0_4 = arith.constant 0 : index
    %c0_5 = arith.constant 0 : index
    %5 = vector.load %arg1[%c1_3, %c0_4, %c0_5] : memref<5x1x128xf32, #tpu.memory_space<vmem>>, vector<1x1x128xf32>
    %6 = vector.shape_cast %5 : vector<1x1x128xf32> to vector<1x128xf32>
    %c2_6 = arith.constant 2 : index
    %c0_7 = arith.constant 0 : index
    %c0_8 = arith.constant 0 : index
    %7 = vector.load %arg1[%c2_6, %c0_7, %c0_8] : memref<5x1x128xf32, #tpu.memory_space<vmem>>, vector<1x1x128xf32>
    %8 = vector.shape_cast %7 : vector<1x1x128xf32> to vector<1x128xf32>
    %c3 = arith.constant 3 : index
    %c0_9 = arith.constant 0 : index
    %c0_10 = arith.constant 0 : index
    %9 = vector.load %arg1[%c3, %c0_9, %c0_10] : memref<5x1x128xf32, #tpu.memory_space<vmem>>, vector<1x1x128xf32>
    %10 = vector.shape_cast %9 : vector<1x1x128xf32> to vector<1x128xf32>
    %cst = arith.constant 9.99999993E-9 : f32
    %11 = vector.broadcast %cst : f32 to vector<1x128xf32>
    %12 = arith.maximumf %10, %11 : vector<1x128xf32>
    %13 = tpu.reciprocal %12 {approx = true} : vector<1x128xf32> -> vector<1x128xf32>
    %14 = arith.mulf %12, %13 : vector<1x128xf32>
    %cst_11 = arith.constant 2.000000e+00 : f32
    %15 = vector.broadcast %cst_11 : f32 to vector<1x128xf32>
    %16 = arith.subf %15, %14 : vector<1x128xf32>
    %17 = arith.mulf %13, %16 : vector<1x128xf32>
    %18 = arith.mulf %8, %17 : vector<1x128xf32>
    %19 = arith.negf %18 : vector<1x128xf32>
    %20 = math.exp %19 : vector<1x128xf32>
    %cst_12 = arith.constant 1.000000e+00 : f32
    %21 = vector.broadcast %cst_12 : f32 to vector<1x128xf32>
    %22 = arith.addf %21, %20 : vector<1x128xf32>
    %23 = arith.divf %21, %22 : vector<1x128xf32>
    %cst_13 = arith.constant 1.000000e+00 : f32
    %24 = vector.broadcast %cst_13 : f32 to vector<1x128xf32>
    %25 = arith.subf %24, %23 : vector<1x128xf32>
    %26 = arith.mulf %23, %25 : vector<1x128xf32>
    %27 = arith.mulf %26, %17 : vector<1x128xf32>
    %28 = arith.mulf %18, %6 : vector<1x128xf32>
    %29 = arith.subf %4, %28 : vector<1x128xf32>
    %30 = arith.mulf %27, %29 : vector<1x128xf32>
    %c4 = arith.constant 4 : index
    %c0_14 = arith.constant 0 : index
    %c0_15 = arith.constant 0 : index
    %31 = vector.load %arg1[%c4, %c0_14, %c0_15] : memref<5x1x128xf32, #tpu.memory_space<vmem>>, vector<1x1x128xf32>
    %32 = vector.shape_cast %31 : vector<1x1x128xf32> to vector<1x128xf32>
    %cst_16 = arith.constant 1.000000e+00 : f32
    %33 = vector.broadcast %cst_16 : f32 to vector<1x128xf32>
    %34 = arith.cmpf oeq, %32, %33 : vector<1x128xf32>
    %35 = arith.extui %34 : vector<1x128xi1> to vector<1x128xi32>
    %36 = arith.sitofp %35 : vector<1x128xi32> to vector<1x128xf32>
    %cst_17 = arith.constant 0.000000e+00 : f32
    %37 = vector.broadcast %cst_17 : f32 to vector<1x128xf32>
    %38 = arith.cmpf oeq, %32, %37 : vector<1x128xf32>
    %39 = arith.extui %38 : vector<1x128xi1> to vector<1x128xi32>
    %40 = arith.sitofp %39 : vector<1x128xi32> to vector<1x128xf32>
    %41 = vector.shape_cast %36 : vector<1x128xf32> to vector<1x1x128xf32>
    %cst_18 = arith.constant dense<0.000000e+00> : vector<1xf32>
    %42 = vector.multi_reduction <add>, %41, %cst_18 [1, 2] : vector<1x1x128xf32> to vector<1xf32>
    %43 = vector.shape_cast %42 : vector<1xf32> to vector<1x1x1xf32>
    %44 = vector.extract %43[0, 0, 0] : f32 from vector<1x1x1xf32>
    %cst_19 = arith.constant 1.000000e+00 : f32
    %45 = arith.divf %cst_19, %44 : f32
    %46 = vector.shape_cast %40 : vector<1x128xf32> to vector<1x1x128xf32>
    %cst_20 = arith.constant dense<0.000000e+00> : vector<1xf32>
    %47 = vector.multi_reduction <add>, %46, %cst_20 [1, 2] : vector<1x1x128xf32> to vector<1xf32>
    %48 = vector.shape_cast %47 : vector<1xf32> to vector<1x1x1xf32>
    %49 = vector.extract %48[0, 0, 0] : f32 from vector<1x1x1xf32>
    %cst_21 = arith.constant 1.000000e+00 : f32
    %50 = arith.divf %cst_21, %49 : f32
    %51 = vector.broadcast %0 : f32 to vector<1x128xf32>
    %52 = arith.subf %23, %51 : vector<1x128xf32>
    %53 = vector.broadcast %1 : f32 to vector<1x128xf32>
    %54 = arith.subf %23, %53 : vector<1x128xf32>
    %55 = arith.mulf %52, %52 : vector<1x128xf32>
    %56 = arith.addf %52, %52 : vector<1x128xf32>
    %57 = vector.broadcast %2 : f32 to vector<1x128xf32>
    %58 = arith.subf %56, %57 : vector<1x128xf32>
    %59 = arith.mulf %58, %30 : vector<1x128xf32>
    %60 = arith.addf %55, %59 : vector<1x128xf32>
    %61 = arith.mulf %54, %54 : vector<1x128xf32>
    %62 = arith.addf %54, %54 : vector<1x128xf32>
    %63 = vector.broadcast %2 : f32 to vector<1x128xf32>
    %64 = arith.addf %62, %63 : vector<1x128xf32>
    %65 = arith.mulf %64, %30 : vector<1x128xf32>
    %66 = arith.addf %61, %65 : vector<1x128xf32>
    %67 = arith.mulf %36, %60 : vector<1x128xf32>
    %68 = vector.broadcast %45 : f32 to vector<1x128xf32>
    %69 = arith.mulf %67, %68 : vector<1x128xf32>
    %70 = arith.mulf %40, %66 : vector<1x128xf32>
    %71 = vector.broadcast %50 : f32 to vector<1x128xf32>
    %72 = arith.mulf %70, %71 : vector<1x128xf32>
    %73 = arith.addf %69, %72 : vector<1x128xf32>
    %74 = vector.shape_cast %73 : vector<1x128xf32> to vector<1x1x128xf32>
    %cst_22 = arith.constant dense<0.000000e+00> : vector<1xf32>
    %75 = vector.multi_reduction <add>, %74, %cst_22 [1, 2] : vector<1x1x128xf32> to vector<1xf32>
    %76 = vector.shape_cast %75 : vector<1xf32> to vector<1x1x1xf32>
    %77 = vector.extract %76[0, 0, 0] : f32 from vector<1x1x1xf32>
    %c0_23 = arith.constant 0 : index
    %c0_24 = arith.constant 0 : index
    %78 = memref.load %arg2[%c0_23, %c0_24] : memref<1x1xf32, #tpu.memory_space<smem>>
    memref.store %77, %arg2[%c0_23, %c0_24] : memref<1x1xf32, #tpu.memory_space<smem>>
    return
  }
}

</mosaic_0001>

<bundles_post_ra>
// kernel: _midam_forward.1
= control target key start
LH: loop header
LB: loop body
LE: loop exit
PB: predicated region body
PF: predicated region fallthrough
CT: control target
= control target key end

     0   :  { %7 = vsyncpa [#allocation4], 0  ;;  %s245_s0 = inlined_call_operand.vmem [shape: f32[3], index: 0, kind: input, shape index: {}]   ;;  %s246_s1 = inlined_call_operand.vmem [shape: f32[5,1,128], index: 1, kind: input, shape index: {}]   ;;  %s247_s2 = inlined_call_operand.hbm [shape: f32[1,1], index: 2, kind: output, shape index: {}]  }
   0x1   :  { %8 = vsyncpa [#allocation3], 0  ;;  %s15_s11 = sshll.u32 %s245_s0, 4  ;;  %s16_s11 = int_to_ptr.vmem [resolvable:$true] %s15_s11 }
   0x2   :  { %s168_s12 = scalar_lea.vmem %s16_s11, 16  ;;  %p173_p1 = scmp.lt.s32.totalorder %s16_s11, %s16_s11 }
   0x3   :  { %p169_p0 = scmp.ne.s32.totalorder %s16_s11, %s168_s12  ;;  %p174_p2 = scmp.lt.s32.totalorder %s168_s12, %s168_s12 }
   0x5   :  { %p175_p3 = por %p174_p2, %p173_p1 }
   0x7   :  { %p176_p4 = pnand %p175_p3, %p169_p0 }
   0x9   :  { %179 = shalt.err (!%p176_p4)
}
   0xa   :  { %s192_s13 = smov [#allocation2]  }
   0xb   :  { %18 = dma.vmem_to_smem %s16_s11, 16, %s192_s13, [#allocation4]  }
   0xc   :  { %188 = dma.done.wait [#allocation4], 16  }
   0xd   :  { %189 = vsyncadd [#allocation4], 4294967280 }
   0xe   :  { %24 = sfence }
   0xf   :  { %v142_v0 = vld [vmem:[%s246_s1 + $0x4] sm:$0x1]  ;;  %vm61_vm0 = vcmask 1040384   ;;  %v193_v1 = vmov 0.0   ;;  %v140_v22 = vld [vmem:[%s246_s1 + $0x3] sm:$0x1] }
  0x10   :  { %vm55_vm1 = vcmp.eq.f32.partialorder %v142_v0, 1.0  ;;  %vm58_vm2 = vcmp.eq.f32.partialorder %v142_v0, 0.0  ;;  %v35_v23 = vmax.f32 %v140_v22, 1e-08  ;;  %v139_v28 = vld [vmem:[%s246_s1 + $0x2] sm:$0x1] }
  0x11   :  { %v216_v2 = vsel %vm55_vm1, 1.0, %v193_v1  ;;  %v218_v3 = vsel %vm58_vm2, 1.0, %v193_v1  ;;  %s25_s22 = sld [smem:[#allocation2]]  ;;  %v138_v37 = vld [vmem:[%s246_s1 + $0x1] sm:$0x1]  ;;  %s194_s30 = smov [#allocation5]  }
  0x12   :  { %v62_v4 = vsel %vm61_vm0, %v216_v2, 0.0  ;;  %v75_v5 = vsel %vm61_vm0, %v218_v3, 0.0  ;;  %s136_s23 = sld [smem:[#allocation2 + $0x1]]  ;;  %v28_v44 = vld [vmem:[%s246_s1] sm:$0x1] }
  0x13   :  { %63 = vadd.xlane.f32.xlu0 %v62_v4  ;;  %s137_s24 = sld [smem:[#allocation2 + $0x2]] }
  0x17   :  { %76 = vadd.xlane.f32.xlu0 %v75_v5  ;;  %v88_v38 = vstv %s25_s22 }
  0x18   :  { %v90_v39 = vstv %s136_s23 }
  0x19   :  { %v94_v49 = vstv %s137_s24 }
  0x9c   :  { %v64_v6 = vpop.xlane.xlu0 %63 }
  0x9d   :  { %v65_v7 = vrot.slane %v64_v6, 4 }
  0x9f   :  { %v66_v8 = vadd.f32 %v65_v7, %v64_v6 }
  0xa0   :  { %v77_v13 = vpop.xlane.xlu0 %76 }
  0xa1   :  { %v67_v9 = vrot.slane %v66_v8, 2  ;;  %v78_v14 = vrot.slane %v77_v13, 4 }
  0xa3   :  { %v68_v10 = vadd.f32 %v67_v9, %v66_v8  ;;  %v79_v15 = vadd.f32 %v78_v14, %v77_v13 }
  0xa5   :  { %v69_v11 = vrot.slane %v68_v10, 1  ;;  %v80_v17 = vrot.slane %v79_v15, 2 }
  0xa7   :  { %v70_v12 = vadd.f32 %v69_v11, %v68_v10  ;;  %v81_v18 = vadd.f32 %v80_v17, %v79_v15 }
  0xa9   :  { %145 = vpush %v70_v12  ;;  %v82_v19 = vrot.slane %v81_v18, 1 }
  0xab   :  { %v83_v21 = vadd.f32 %v82_v19, %v81_v18 }
  0xda   :  { %s146_s0 = spop %145 }
  0xdb   :  { %v72_v16 = vstv %s146_s0 }
  0xdc   :  { %158 = vrcp.f32 %v72_v16 }
  0xdd   :  { %160 = vrcp.f32 %v35_v23 }
  0xe9   :  { %v159_v20 = vpop.eup %158 }
  0xea   :  { %147 = vpush %v159_v20  ;;  %v161_v24 = vpop.eup %160 }
  0xeb   :  { %149 = vpush %v83_v21  ;;  %v37_v25 = vmul.f32 %v161_v24, %v35_v23 }
  0xed   :  { %v38_v26 = vsub.f32 2.0, %v37_v25 }
  0xef   :  { %v39_v27 = vmul.f32 %v161_v24, %v38_v26 }
  0xf1   :  { %v40_v29 = vmul.f32 %v139_v28, %v39_v27 }
  0xf3   :  { %v141_v30 = vmul.f32 -1.442695, %v40_v29  ;;  %v50_v41 = vmul.f32 %v138_v37, %v40_v29 }
  0xf5   :  { %v51_v46 = vsub.f32 %v28_v44, %v50_v41 }
 0x11b   :  { %s230_s20 = spop %147 }
 0x11c   :  { %s150_s21 = spop %149  ;;  %v104_v61 = vstv %s230_s20 }
 0x11d   :  { %v85_v31 = vstv %s150_s21 }
 0x11e   :  { %162 = vrcp.f32 %v85_v31 }
 0x11f   :  { %164 = vpow2.f32 %v141_v30 }
 0x12b   :  { %v163_v32 = vpop.eup %162 }
 0x12c   :  { %v165_v33 = vpop.eup %164  ;;  %151 = vpush %v163_v32 }
 0x12d   :  { %v44_v34 = vadd.f32 1.0, %v165_v33 }
 0x12f   :  { %166 = vrcp.f32 %v44_v34 }
 0x13c   :  { %v167_v35 = vpop.eup %166 }
 0x13d   :  { %v47_v36 = vsub.f32 1.0, %v167_v35  ;;  %v89_v42 = vsub.f32 %v167_v35, %v88_v38  ;;  %v91_v43 = vsub.f32 %v167_v35, %v90_v39 }
 0x13f   :  { %v48_v40 = vmul.f32 %v167_v35, %v47_v36  ;;  %v93_v47 = vadd.f32 %v89_v42, %v89_v42  ;;  %v99_v48 = vadd.f32 %v91_v43, %v91_v43  ;;  %v92_v53 = vmul.f32 %v89_v42, %v89_v42 }
 0x140   :  { %v98_v55 = vmul.f32 %v91_v43, %v91_v43 }
 0x141   :  { %v49_v45 = vmul.f32 %v48_v40, %v39_v27  ;;  %v95_v51 = vsub.f32 %v93_v47, %v94_v49  ;;  %v100_v52 = vadd.f32 %v99_v48, %v94_v49 }
 0x143   :  { %v52_v50 = vmul.f32 %v51_v46, %v49_v45 }
 0x145   :  { %v96_v54 = vmul.f32 %v95_v51, %v52_v50  ;;  %v101_v56 = vmul.f32 %v100_v52, %v52_v50 }
 0x147   :  { %v97_v57 = vadd.f32 %v96_v54, %v92_v53  ;;  %v102_v58 = vadd.f32 %v101_v56, %v98_v55 }
 0x149   :  { %v103_v59 = vmul.f32 %v216_v2, %v97_v57  ;;  %v106_v60 = vmul.f32 %v218_v3, %v102_v58 }
 0x14b   :  { %v105_v63 = vmul.f32 %v104_v61, %v103_v59 }
 0x15d   :  { %s152_s1 = spop %151 }
 0x15e   :  { %v107_v62 = vstv %s152_s1 }
 0x15f   :  { %v108_v0 = vmul.f32 %v107_v62, %v106_v60 }
 0x161   :  { %v109_v1 = vadd.f32 %v108_v0, %v105_v63 }
 0x163   :  { %v110_v4 = vsel %vm61_vm0, %v109_v1, 0.0 }
 0x164   :  { %111 = vadd.xlane.f32.xlu1 %v110_v4 }
 0x1ed   :  { %v112_v5 = vpop.xlane.xlu1 %111 }
 0x1ee   :  { %v113_v6 = vrot.slane %v112_v5, 4 }
 0x1f0   :  { %v114_v7 = vadd.f32 %v113_v6, %v112_v5 }
 0x1f2   :  { %v115_v8 = vrot.slane %v114_v7, 2 }
 0x1f4   :  { %v116_v9 = vadd.f32 %v115_v8, %v114_v7 }
 0x1f6   :  { %v117_v10 = vrot.slane %v116_v9, 1 }
 0x1f8   :  { %v118_v11 = vadd.f32 %v117_v10, %v116_v9 }
 0x1fa   :  { %153 = vpush %v118_v11 }
 0x22b   :  { %s154_s29 = spop %153 }
 0x22c   :  { %121 = sst [smem:[#allocation5]] %s154_s29 }
 0x22d   :  { %129 = dma.smem_to_hbm %s194_s30, 16, %s247_s2, [#allocation3]  }
 0x22e   :  { %190 = dma.done.wait [#allocation3], 16  }
 0x22f   :  { %191 = vsyncadd [#allocation3], 4294967280 }
 0x230   :  { %133 = sfence }
 0x231   :  { %134 = vsyncpa [#allocation3], 1 }
 0x232   :  { %135 = vsyncpa [#allocation4], 1 }

</bundles_post_ra>
